<compile_context>
chip_gen: v7x
topology: tpu7x:2x2x1
jax: 0.10.0
libtpu: 0.0.40
codegen_flags: <defaults>
</compile_context>

<pallas_src>
import functools

import jax
import jax.numpy as jnp
import numpy as np
from jax.experimental import pallas as pl
from jax.experimental.pallas import tpu as pltpu

_LANE = 128


def _round_up(x, m):
    return (x + m - 1) // m * m


def _decoder_kernel(x_ref, t4_ref, t5t_ref, t3g_ref, t3l_ref, q_ref, *, n_nodes):
    # x_ref:   (P, NP)  feature-major slab for one batch (bf16 or f32)
    # t4_ref:  (P, P)   theta4 (row-major, f32)
    # t5t_ref: (P, P)   theta5^T (bf16 or f32)
    # t3g_ref: (1, P)   theta3[:p]  as a row (f32)
    # t3l_ref: (P, 1)   theta3[p:]  as a column (f32)
    # q_ref:   (1, NP)  lane-dense output row for this batch (f32)
    x = x_ref[...]                                                      # (P, NP)

    # ---- global branch: computed once per batch, VPU + XLU only ----
    # global_state as a column (P, 1); accumulate the mean in f32.
    gs_col = jnp.sum(x.astype(jnp.float32), axis=1, keepdims=True) * (1.0 / n_nodes)
    # global_feature[i] = sum_j gs[j] * theta4[j, i]  -> sublane reduce -> (1, P)
    gf_row = jnp.sum(t4_ref[...] * gs_col, axis=0, keepdims=True)
    # q_global = relu(global_feature) . theta3[:p]  -> (1, 1)
    q_g = jnp.sum(jnp.maximum(gf_row, 0.0) * t3g_ref[...], axis=1, keepdims=True)

    # ---- local branch: MXU matmul with f32 accumulation ----
    # local_feature^T = theta5^T @ x^T : (P, NP)
    lf_t = jnp.dot(t5t_ref[...], x, preferred_element_type=jnp.float32)
    # q_local[n] = sum_i relu(lf^T[i, n]) * theta3[p + i]  -> sublane reduce -> (1, NP)
    q_l = jnp.sum(jnp.maximum(lf_t, 0.0) * t3l_ref[...], axis=0, keepdims=True)

    # Lane-dense (1, NP) store; q_global broadcast-added in the epilogue.
    q_ref[...] = (q_g + q_l).astype(q_ref.dtype)


def decoder_forward(mu_v_prime, theta3, theta4, theta5, *, mxu_dtype=jnp.bfloat16):
    """mu_v_prime: (B, N, p); theta3: (2p,); theta4/theta5: (p, p) -> q: (B, N)."""
    B, N, p = mu_v_prime.shape
    P = max(_round_up(p, _LANE), _LANE)     # padded feature dim (lane-dense, full MXU depth)
    NP = max(_round_up(N, _LANE), _LANE)    # padded node dim (lane-dense output rows)

    # ---- wrapper-side layout plumbing (free XLA ops; nothing hidden in-kernel) ----
    x_t = jnp.transpose(mu_v_prime, (0, 2, 1)).astype(mxu_dtype)        # (B, p, N)
    x_t = jnp.pad(x_t, ((0, 0), (0, P - p), (0, NP - N)))               # (B, P, NP)
    t4 = jnp.pad(theta4.astype(jnp.float32), ((0, P - p), (0, P - p)))  # (P, P)
    t5t = jnp.pad(jnp.transpose(theta5).astype(mxu_dtype),
                  ((0, P - p), (0, P - p)))                             # (P, P)
    t3g = jnp.pad(theta3[:p].astype(jnp.float32), (0, P - p)).reshape(1, P)
    t3l = jnp.pad(theta3[p:].astype(jnp.float32), (0, P - p)).reshape(P, 1)

    kernel = functools.partial(_decoder_kernel, n_nodes=N)

    itemsize = jnp.dtype(mxu_dtype).itemsize
    cost = pl.CostEstimate(
        # local matmul dominates; global branch + reductions are O(P*P) per batch.
        flops=int(2 * B * P * P * NP + 4 * B * P * P + 4 * B * P * NP),
        transcendentals=0,
        bytes_accessed=int(B * P * NP * itemsize          # x slabs
                           + P * P * (4 + itemsize)       # theta4 (f32) + theta5^T
                           + 2 * P * 4                    # theta3 halves
                           + B * NP * 4),                 # output rows
    )

    q_pad = pl.pallas_call(
        kernel,
        out_shape=jax.ShapeDtypeStruct((B, 1, NP), jnp.float32),
        grid_spec=pl.GridSpec(
            grid=(B,),
            in_specs=[
                pl.BlockSpec((None, P, NP), lambda b: (b, 0, 0)),  # x^T, one batch/step
                pl.BlockSpec((P, P), lambda b: (0, 0)),            # theta4   (resident)
                pl.BlockSpec((P, P), lambda b: (0, 0)),            # theta5^T (resident)
                pl.BlockSpec((1, P), lambda b: (0, 0)),            # theta3[:p]
                pl.BlockSpec((P, 1), lambda b: (0, 0)),            # theta3[p:]
            ],
            out_specs=pl.BlockSpec((None, 1, NP), lambda b: (b, 0, 0)),
        ),
        compiler_params=pltpu.CompilerParams(
            dimension_semantics=("parallel",)),
        cost_estimate=cost,
    )(x_t, t4, t5t, t3g, t3l)

    return q_pad[:, 0, :N]


def decoder_forward_ref(mu_v_prime, theta3, theta4, theta5):
    """Pure-JAX reference mirroring the PyTorch module exactly."""
    global_state = jnp.mean(mu_v_prime, axis=1, keepdims=True)          # (B, 1, p)
    global_feature = jnp.matmul(global_state, theta4)                   # (B, 1, p)
    local_feature = jnp.matmul(mu_v_prime, theta5)                      # (B, N, p)
    combined = jnp.concatenate(
        [jnp.broadcast_to(global_feature, mu_v_prime.shape), local_feature], axis=-1)
    return jnp.matmul(jax.nn.relu(combined), theta3)                    # (B, N)


if __name__ == "__main__":
    B, N, p = 2, 8, 32  # batch, nodes (seq), hidden

    key = jax.random.PRNGKey(0)
    k_x, k3, k4, k5 = jax.random.split(key, 4)

    mu_v_prime = jax.random.normal(k_x, (B, N, p), dtype=jnp.float32)
    theta3 = jax.random.normal(k3, (2 * p,), dtype=jnp.float32)
    theta4 = jax.random.normal(k4, (p, p), dtype=jnp.float32)
    theta5 = jax.random.normal(k5, (p, p), dtype=jnp.float32)

    q_ref = decoder_forward_ref(mu_v_prime, theta3, theta4, theta5)

    # Exactness check: f32 MXU operands -> matches the PyTorch math to fp error.
    q_f32 = jax.block_until_ready(
        decoder_forward(mu_v_prime, theta3, theta4, theta5, mxu_dtype=jnp.float32))
    np.testing.assert_allclose(np.asarray(q_f32), np.asarray(q_ref),
                               rtol=1e-5, atol=1e-5)

    # Default perf path: bf16 MXU operands with f32 accumulation (v6e/v7x native).
    q_bf16 = jax.block_until_ready(
        decoder_forward(mu_v_prime, theta3, theta4, theta5))
    np.testing.assert_allclose(np.asarray(q_bf16), np.asarray(q_ref),
                               rtol=5e-2, atol=1.0)

    print("KERNEL_OK")
</pallas_src>

<mosaic_0001>
module attributes {stable_mosaic.version = 11 : i64} {
  func.func @_decoder_kernel(%arg0: i32, %arg1: memref<1x128x128xf32, #tpu.memory_space<vmem>>, %arg2: memref<128x128xf32, #tpu.memory_space<vmem>>, %arg3: memref<128x128xf32, #tpu.memory_space<vmem>>, %arg4: memref<1x128xf32, #tpu.memory_space<vmem>>, %arg5: memref<128x1xf32, #tpu.memory_space<vmem>>, %arg6: memref<1x1x128xf32, #tpu.memory_space<vmem>>) attributes {dimension_semantics = [#tpu.dimension_semantics<parallel>], iteration_bounds = array<i64: 2>, scalar_prefetch = 0 : i64, scratch_operands = 0 : i64, tpu.core_type = #tpu.core_type<tc>, window_params = [{transform_indices = @transform_0, window_bounds = array<i64: 1, 128, 128>}, {pipeline_mode = #tpu.pipeline_mode<synchronous>, transform_indices = @transform_1, window_bounds = array<i64: 128, 128>}, {pipeline_mode = #tpu.pipeline_mode<synchronous>, transform_indices = @transform_2, window_bounds = array<i64: 128, 128>}, {pipeline_mode = #tpu.pipeline_mode<synchronous>, transform_indices = @transform_3, window_bounds = array<i64: 1, 128>}, {pipeline_mode = #tpu.pipeline_mode<synchronous>, transform_indices = @transform_4, window_bounds = array<i64: 128, 1>}, {transform_indices = @transform_5, window_bounds = array<i64: 1, 1, 128>}]} {
    %c0 = arith.constant 0 : index
    %c0_0 = arith.constant 0 : index
    %c0_1 = arith.constant 0 : index
    %0 = vector.load %arg1[%c0, %c0_0, %c0_1] : memref<1x128x128xf32, #tpu.memory_space<vmem>>, vector<1x128x128xf32>
    %1 = vector.shape_cast %0 : vector<1x128x128xf32> to vector<128x128xf32>
    %cst = arith.constant dense<0.000000e+00> : vector<128xf32>
    %2 = vector.multi_reduction <add>, %1, %cst [1] : vector<128x128xf32> to vector<128xf32>
    %3 = vector.shape_cast %2 : vector<128xf32> to vector<128x1xf32>
    %cst_2 = arith.constant 1.250000e-01 : f32
    %4 = vector.broadcast %cst_2 : f32 to vector<128x1xf32>
    %5 = arith.mulf %3, %4 : vector<128x1xf32>
    %c0_3 = arith.constant 0 : index
    %c0_4 = arith.constant 0 : index
    %6 = vector.load %arg2[%c0_3, %c0_4] : memref<128x128xf32, #tpu.memory_space<vmem>>, vector<128x128xf32>
    %7 = vector.broadcast %5 : vector<128x1xf32> to vector<128x128xf32>
    %8 = arith.mulf %6, %7 : vector<128x128xf32>
    %cst_5 = arith.constant dense<0.000000e+00> : vector<128xf32>
    %9 = vector.multi_reduction <add>, %8, %cst_5 [0] : vector<128x128xf32> to vector<128xf32>
    %10 = vector.shape_cast %9 : vector<128xf32> to vector<1x128xf32>
    %cst_6 = arith.constant 0.000000e+00 : f32
    %11 = vector.broadcast %cst_6 : f32 to vector<1x128xf32>
    %12 = arith.maximumf %10, %11 : vector<1x128xf32>
    %c0_7 = arith.constant 0 : index
    %c0_8 = arith.constant 0 : index
    %13 = vector.load %arg4[%c0_7, %c0_8] : memref<1x128xf32, #tpu.memory_space<vmem>>, vector<1x128xf32>
    %14 = arith.mulf %12, %13 : vector<1x128xf32>
    %cst_9 = arith.constant dense<0.000000e+00> : vector<1xf32>
    %15 = vector.multi_reduction <add>, %14, %cst_9 [1] : vector<1x128xf32> to vector<1xf32>
    %16 = vector.shape_cast %15 : vector<1xf32> to vector<1x1xf32>
    %c0_10 = arith.constant 0 : index
    %c0_11 = arith.constant 0 : index
    %17 = vector.load %arg3[%c0_10, %c0_11] : memref<128x128xf32, #tpu.memory_space<vmem>>, vector<128x128xf32>
    %cst_12 = arith.constant dense<0.000000e+00> : vector<128x128xf32>
    %18 = tpu.matmul %17, %1, %cst_12 {dimension_numbers = #tpu.dot_dimension_numbers<[1], [0], [0], [1], [0, 0, 1, 1], [], []>} : vector<128x128xf32>, vector<128x128xf32>, vector<128x128xf32> -> vector<128x128xf32>
    %cst_13 = arith.constant 0.000000e+00 : f32
    %19 = vector.broadcast %cst_13 : f32 to vector<128x128xf32>
    %20 = arith.maximumf %18, %19 : vector<128x128xf32>
    %c0_14 = arith.constant 0 : index
    %c0_15 = arith.constant 0 : index
    %21 = vector.load %arg5[%c0_14, %c0_15] : memref<128x1xf32, #tpu.memory_space<vmem>>, vector<128x1xf32>
    %22 = vector.broadcast %21 : vector<128x1xf32> to vector<128x128xf32>
    %23 = arith.mulf %20, %22 : vector<128x128xf32>
    %cst_16 = arith.constant dense<0.000000e+00> : vector<128xf32>
    %24 = vector.multi_reduction <add>, %23, %cst_16 [0] : vector<128x128xf32> to vector<128xf32>
    %25 = vector.shape_cast %24 : vector<128xf32> to vector<1x128xf32>
    %26 = vector.broadcast %16 : vector<1x1xf32> to vector<1x128xf32>
    %27 = arith.addf %26, %25 : vector<1x128xf32>
    %c0_17 = arith.constant 0 : index
    %c0_18 = arith.constant 0 : index
    %c0_19 = arith.constant 0 : index
    %28 = vector.load %arg6[%c0_17, %c0_18, %c0_19] : memref<1x1x128xf32, #tpu.memory_space<vmem>>, vector<1x1x128xf32>
    %29 = vector.shape_cast %28 : vector<1x1x128xf32> to vector<1x128xf32>
    %30 = vector.shape_cast %27 : vector<1x128xf32> to vector<1x1x128xf32>
    tpu.vector_store %arg6[%c0_17, %c0_18, %c0_19], %30 {strides = array<i32>} : memref<1x1x128xf32, #tpu.memory_space<vmem>>, vector<1x1x128xf32>,
    return
  }
  func.func @transform_0(%arg0: i32) -> (i32, i32, i32) {
    %c0_i32 = arith.constant 0 : i32
    %c0_i32_0 = arith.constant 0 : i32
    %c0_i32_1 = arith.constant 0 : i32
    return %arg0, %c0_i32, %c0_i32_0 : i32, i32, i32
  }
  func.func @transform_1(%arg0: i32) -> (i32, i32) {
    %c0_i32 = arith.constant 0 : i32
    %c0_i32_0 = arith.constant 0 : i32
    %c0_i32_1 = arith.constant 0 : i32
    return %c0_i32, %c0_i32_0 : i32, i32
  }
  func.func @transform_2(%arg0: i32) -> (i32, i32) {
    %c0_i32 = arith.constant 0 : i32
    %c0_i32_0 = arith.constant 0 : i32
    %c0_i32_1 = arith.constant 0 : i32
    return %c0_i32, %c0_i32_0 : i32, i32
  }
  func.func @transform_3(%arg0: i32) -> (i32, i32) {
    %c0_i32 = arith.constant 0 : i32
    %c0_i32_0 = arith.constant 0 : i32
    %c0_i32_1 = arith.constant 0 : i32
    return %c0_i32, %c0_i32_0 : i32, i32
  }
  func.func @transform_4(%arg0: i32) -> (i32, i32) {
    %c0_i32 = arith.constant 0 : i32
    %c0_i32_0 = arith.constant 0 : i32
    %c0_i32_1 = arith.constant 0 : i32
    return %c0_i32, %c0_i32_0 : i32, i32
  }
  func.func @transform_5(%arg0: i32) -> (i32, i32, i32) {
    %c0_i32 = arith.constant 0 : i32
    %c0_i32_0 = arith.constant 0 : i32
    %c0_i32_1 = arith.constant 0 : i32
    return %arg0, %c0_i32, %c0_i32_0 : i32, i32, i32
  }
}

</mosaic_0001>

<bundles_post_ra>
// kernel: tpu_custom_call.1
= control target key start
LH: loop header
LB: loop body
LE: loop exit
PB: predicated region body
PF: predicated region fallthrough
CT: control target
= control target key end

     0   :  { %10 = vsyncpa [#allocation3], 0  ;;  %s1483_s0 = inlined_call_operand.hbm [shape: f32[2,128,128], index: 0, kind: input, shape index: {}]   ;;  %s1484_s1 = inlined_call_operand.vmem [shape: f32[128,128], index: 1, kind: input, shape index: {}]   ;;  %s1485_s2 = inlined_call_operand.hbm [shape: f32[128,128], index: 2, kind: input, shape index: {}]   ;;  %s1486_s3 = inlined_call_operand.vmem [shape: f32[1,128], index: 3, kind: input, shape index: {}]   ;;  %s1487_s4 = inlined_call_operand.vmem [shape: f32[128,1], index: 4, kind: input, shape index: {}]   ;;  %s1488_s5 = inlined_call_operand.hbm [shape: f32[2,1,128], index: 5, kind: output, shape index: {}]  }
   0x1   :  { %12 = vsyncpa [#allocation3 + $0x1], 0 }
   0x2   :  { %13 = vsyncpa [#allocation6], 0 }
   0x3   :  { %14 = vsyncpa [#allocation4], 0 }
   0x4   :  { %16 = vsyncpa [#allocation4 + $0x1], 0  ;;  %s1160_s18 = smov 0   ;;  %s1162_s19 = smov 0  }
   0x5   :  { %s1164_s20 = smov 0   ;;  %s1166_s21 = smov 0  }
   0x6 LB: > { %s1181_s22 = sadd.s32 4294967295, %s1122_s21   ;;  %s782_s23 = sadd.s32 4294967294, %s1122_s21   ;;  %s1122_s21 = sphi %s1166_s21, %s1508_s21   ;;  %s1118_s20 = sphi %s1164_s20, %s1507_s20   ;;  %s1114_s19 = sphi %s1162_s19, %s1506_s19   ;;  %s1110_s18 = sphi %s1160_s18, %s1505_s18  }
   0x7   : > { %p42_p0 = scmp.ne.s32.totalorder %s1114_s19, %s1110_s18  ;;  %p1489_p1 = scmp.eq.s32.totalorder %s1181_s22, 0 }
   0x8   : > { %p156_p3 = scmp.eq.s32.totalorder %s782_s23, 1  ;;  %p783_p5 = scmp.ge.s32.totalorder %s1122_s21, 1 }
   0x9   : > { %p1190_p4 = por %p1489_p1, %p42_p0  ;;  %p163_p7 = scmp.lt.s32.totalorder %s1122_s21, 3 }
   0xa   : > { %p1195_p6 = por %p156_p3, %p42_p0  ;;  %s1124_s27 = smov [#allocation5]  }
   0xb   : > { %s1492_s24 = scalar_select %p1190_p4, 1, 0 }
   0xc   : > { %s1493_s25 = scalar_select %p1195_p6, 1, 0 }
   0xd   : > { %p1200_p8 = pnand %p783_p5, %p163_p7  ;;  %s178_s28 = sshll.u32 %s1124_s27, 4  ;;  %s1204_s28 = int_to_ptr.vmem [resolvable:$true] %s178_s28 }
   0xe   : > { %s1216_s30 = sadd.s32 1, %s1122_s21   ;;  %s29_s6 = sadd.s32 1, %s1118_s20 }
   0xf   : > { %s1494_s26 = scalar_select %p1200_p8, 1, 0 }
  0x10   : > { %p940_p9 = pneg %p1200_p8  ;;  %s26_s7 = ssub.s32 %s1122_s21, %s1216_s30 }
  0x11   : > { %s994_s10 = scalar_lea.hbm %s1485_s2, 2048 }
  0x12   : > { %p1211_p11 = pnand %p940_p9, %p1489_p1  ;;  %p995_p12 = scmp.ne.s32.totalorder %s1485_s2, %s994_s10 }
  0x13   : > { %p1001_p5 = scmp.lt.u32.totalorder %s994_s10, %s1485_s2 }
  0x14   : > { %p996_p13 = pneg %p1211_p11 }
  0x16   : > { %p997_p0 = pnand %p996_p13, %p995_p12 }
  0x18   : > { %p998_p3 = pneg %p997_p0 }
  0x1a   : > { %p1003_p7 = pnand %p1001_p5, %p998_p3 }
  0x1c   : > { %1006 = shalt.err (!%p1003_p7)
}
  0x1d   : > { %s1007_s15 = scalar_lea.vmem %s1204_s28, 2048  ;;  %p1015_p2 = scmp.lt.s32.totalorder %s1204_s28, %s1204_s28 }
  0x1e   : > { %p1008_p9 = scmp.ne.s32.totalorder %s1204_s28, %s1007_s15  ;;  %p1016_p6 = scmp.lt.s32.totalorder %s1007_s15, %s1007_s15 }
  0x20   : > { %p1010_p10 = pnand %p1008_p9, %p996_p13  ;;  %p1017_p4 = por %p1016_p6, %p1015_p2 }
  0x22   : > { %p1011_p1 = pneg %p1010_p10 }
  0x24   : > { %p1018_p8 = pnand %p1017_p4, %p1011_p1 }
  0x26   : > { %1021 = shalt.err (!%p1018_p8)
}
  0x27   : > { %s1125_s16 = smov 128   ;;  %s1126_s17 = smov 8  }
  0x28   : > { %943 = dma.hbm_to_vmem [thread:$0]  (!%p1211_p11), %s1485_s2, 2048, %s1204_s28, [#allocation6], %s1125_s16, %s1125_s16, %s1126_s17  }
  0x29   : > { %p27_p1 = scmp.eq.s32.totalorder %s26_s7, 0  ;;  %p36_p2 = scmp.ne.s32.totalorder %s1118_s20, %s1114_s19 }
  0x2a   : > { %p37_p4 = scmp.eq.s32.totalorder %s1122_s21, 0  ;;  %p953_p6 = scmp.lt.s32.totalorder %s1122_s21, 2 }
  0x2b   : > { %s1250_s8 = scalar_select %p27_p1, %s1118_s20, %s29_s6  }
  0x2c   : > { %p38_p8 = por %p37_p4, %p36_p2  ;;  %p1496_p10 = scmp.eq.s32.totalorder %s1181_s22, 1 }
  0x2d   : > { %s198_s29 = sand.u32 1, %s1118_s20   ;;  %s795_s10 = sshll.u32 %s1122_s21, 11 }
  0x2e   : > { %p1254_p12 = por %p1496_p10, %p36_p2  ;;  %s786_s11 = sshll.u32 %s198_s29, 7 }
  0x2f   : > { %s1263_s14 = scalar_lea.hbm %s1483_s0, %s795_s10  ;;  %s202_s28 = scalar_lea.vmem [#allocation2], %s786_s11 }
  0x30   : > { %s209_s6 = sshll.u32 %s202_s28, 4  ;;  %p1265_p11 = pnand %p953_p6, %p38_p8  ;;  %s1269_s6 = int_to_ptr.vmem [resolvable:$true] %s209_s6 }
  0x31   : > { %s1271_s15 = scalar_lea.sflag [#allocation3], %s198_s29  ;;  %s1022_s23 = scalar_lea.hbm %s1263_s14, 2048 }
  0x32   : > { %p1023_p13 = scmp.ne.s32.totalorder %s1263_s14, %s1022_s23  ;;  %p1024_p0 = pneg %p1265_p11 }
  0x33   : > { %s1027_s11 = scalar_lea.hbm %s1483_s0, 4096  ;;  %p1028_p7 = scmp.lt.u32.totalorder %s1263_s14, %s1483_s0 }
  0x34   : > { %p1025_p3 = pnand %p1024_p0, %p1023_p13  ;;  %p1029_p9 = scmp.lt.u32.totalorder %s1027_s11, %s1022_s23 }
  0x35   : > { %p1031_p2 = scmp.lt.u32.totalorder %s1022_s23, %s1263_s14 }
  0x36   : > { %p1026_p5 = pneg %p1025_p3  ;;  %p1030_p1 = por %p1029_p9, %p1028_p7 }
  0x38   : > { %p1032_p4 = por %p1031_p2, %p1030_p1 }
  0x3a   : > { %p1033_p6 = pnand %p1032_p4, %p1026_p5 }
  0x3c   : > { %1036 = shalt.err (!%p1033_p6)
}
  0x3d   : > { %s1037_s29 = scalar_lea.vmem %s1269_s6, 2048  ;;  %s1127_s28 = smov [#allocation2]  }
  0x3e   : > { %p1038_p8 = scmp.ne.s32.totalorder %s1269_s6, %s1037_s29  ;;  %s1042_s27 = sshll.u32 %s1127_s28, 4  ;;  %s1043_s27 = int_to_ptr.vmem [resolvable:$false] %s1042_s27 }
  0x3f   : > { %s1044_s10 = scalar_lea.vmem %s1043_s27, 4096  ;;  %p1045_p3 = scmp.lt.s32.totalorder %s1269_s6, %s1043_s27 }
  0x40   : > { %p1040_p10 = pnand %p1038_p8, %p1024_p0  ;;  %p1046_p7 = scmp.lt.s32.totalorder %s1044_s10, %s1037_s29 }
  0x42   : > { %p1041_p13 = pneg %p1040_p10  ;;  %p1047_p9 = por %p1046_p7, %p1045_p3 }
  0x44   : > { %p1048_p1 = pnand %p1047_p9, %p1041_p13 }
  0x46   : > { %1051 = shalt.err (!%p1048_p1)
}
  0x47   : > { %947 = dma.hbm_to_vmem [thread:$0]  (!%p1265_p11), %s1263_s14, 2048, %s1269_s6, %s1271_s15, %s1125_s16, %s1125_s16, %s1126_s17  }
  0x48   : > { %p1499_p0 = scmp.ne.s32.totalorder %s1494_s26, 0 }
  0x49   : > { %s1305_s23 = sand.u32 (!%p1499_p0), 1, %s1114_s19   ;;  %p1500_p5 = scmp.ne.s32.totalorder (!%p1499_p0), %s1492_s24, 0 }
  0x4a   : > { %221 = sbr.rel (%p1499_p0) target bundleno = 442 (0x1ba), region = 40  ;;  %s790_s11 = sshll.u32 (!%p1499_p0), %s1305_s23, 7 }
  0x4b   : > { %s224_s12 = scalar_lea.sflag (!%p1499_p0), [#allocation3], %s1305_s23  ;;  %s1309_s13 = scalar_lea.vmem (!%p1499_p0), [#allocation2], %s790_s11 }
  0x51   : > { %1097 = dma.done.wait (%p1500_p5), %s224_s12, 2048  }
  0x52   : > { %1099 = vsyncadd (%p1500_p5), %s224_s12, 4294965248  ;;  %p1501_p11 = scmp.eq.s32.totalorder %s1181_s22, 0 }
  0x54   : > { %1101 = dma.done.wait (%p1501_p11), [#allocation6], 2048   ;;  %p1502_p2 = pmov %p1501_p11 }
  0x55   : > { %v1128_v0 = vmov 0   ;;  %v257_v1 = vld [vmem:[%s1309_s13] sm:$0xff]  ;;  %v258_v2 = vld [vmem:[%s1309_s13 + $0x8] sm:$0xff]  ;;  %v259_v3 = vld [vmem:[%s1309_s13 + $0x10] sm:$0xff]  ;;  %vm377_vm0 = vcmask 1040384   ;;  %s792_s7 = sshll.u32 %s1181_s22, 4 }
  0x56   : > { %1103 = vsyncadd (%p1502_p2), [#allocation6], 4294965248  ;;  %993 = vset.pattern.permute.xlu1 %v1128_v0  ;;  %992 = vset.pattern.permute.xlu0 %v1128_v0  ;;  %v884_v4 = vpack.c.bf16 %v258_v2, %v257_v1  ;;  %v260_v5 = vld [vmem:[%s1309_s13 + $0x18] sm:$0xff]  ;;  %v261_v7 = vld [vmem:[%s1309_s13 + $0x20] sm:$0xff]  ;;  %s256_s15 = scalar_lea.vmem [#allocation7], %s1305_s23  ;;  %s1439_s10 = scalar_lea.hbm %s1488_s5, %s792_s7 }
  0x57   : > { %273 = vadd.xlane.f32.xlu0 %v257_v1  ;;  %277 = vadd.xlane.f32.xlu1 %v259_v3  ;;  %v888_v6 = vpack.c.bf16 %v260_v5, %v259_v3  ;;  %v262_v8 = vld [vmem:[%s1309_s13 + $0x28] sm:$0xff]  ;;  %v381_v10 = vld [vmem:[#allocation5] sm:$0xff]  ;;  %v263_v12 = vld [vmem:[%s1309_s13 + $0x30] sm:$0xff]  ;;  %s706_s29 = sshll.u32 %s256_s15, 4  ;;  %s694_s11 = scalar_lea.sflag [#allocation4], %s1305_s23  ;;  %s1441_s29 = int_to_ptr.vmem [resolvable:$true] %s706_s29 }
  0x58   : > { %885 = vmatprep.subr.bf16.mxu0 %v884_v4  ;;  %916 = vmatprep.subr.bf16.mxu1 %v884_v4  ;;  %v892_v9 = vpack.c.bf16 %v262_v8, %v261_v7  ;;  %v389_v11 = vld [vmem:[#allocation5 + $0x40] sm:$0xff]  ;;  %v264_v13 = vld [vmem:[%s1309_s13 + $0x38] sm:$0xff]  ;;  %v266_v16 = vld [vmem:[%s1309_s13 + $0x48] sm:$0xff]  ;;  %s1052_s12 = scalar_lea.vmem %s1441_s29, 16  ;;  %s1129_s22 = smov [#allocation7]  }
  0x59   : > { %887 = vmatpush3.bf16.msra.mxu0 %v884_v4  ;;  %924 = vmatpush3.bf16.msra.mxu1 %v884_v4  ;;  %v896_v14 = vpack.c.bf16 %v264_v13, %v263_v12  ;;  %v265_v15 = vld [vmem:[%s1309_s13 + $0x40] sm:$0xff]  ;;  %v267_v18 = vld [vmem:[%s1309_s13 + $0x50] sm:$0xff]  ;;  %v268_v19 = vld [vmem:[%s1309_s13 + $0x58] sm:$0xff]  ;;  %p1053_p4 = scmp.ne.s32.totalorder %s1441_s29, %s1052_s12 }
  0x5a   : > { %889 = vmatprep.subr.bf16.mxu0 %v888_v6  ;;  %917 = vmatprep.subr.bf16.mxu1 %v888_v6  ;;  %v900_v17 = vpack.c.bf16 %v266_v16, %v265_v15  ;;  %v904_v20 = vpack.c.bf16 %v268_v19, %v267_v18  ;;  %v269_v21 = vld [vmem:[%s1309_s13 + $0x60] sm:$0xff]  ;;  %v270_v22 = vld [vmem:[%s1309_s13 + $0x68] sm:$0xff]  ;;  %v271_v24 = vld [vmem:[%s1309_s13 + $0x70] sm:$0xff] }
  0x5b   : > { %275 = vadd.xlane.f32.xlu0 %v258_v2  ;;  %279 = vadd.xlane.f32.xlu1 %v260_v5  ;;  %v908_v23 = vpack.c.bf16 %v270_v22, %v269_v21  ;;  %v272_v25 = vld [vmem:[%s1309_s13 + $0x78] sm:$0xff]  ;;  %v382_v27 = vld [vmem:[#allocation5 + $0x8] sm:$0xff]  ;;  %v383_v29 = vld [vmem:[#allocation5 + $0x10] sm:$0xff]  ;;  %p1054_p6 = pnand %p1053_p4, %p1254_p12  ;;  %s1056_s13 = sshll.u32 %s1129_s22, 4  ;;  %s1057_s13 = int_to_ptr.vmem [resolvable:$false] %s1056_s13 }
  0x5c   : > { %860 = vmatprep.mubr.f32.mxu0 %v381_v10  ;;  %872 = vmatprep.mubr.f32.mxu1 %v389_v11  ;;  %v912_v26 = vpack.c.bf16 %v272_v25, %v271_v24  ;;  %v390_v28 = vld [vmem:[#allocation5 + $0x48] sm:$0xff]  ;;  %v391_v30 = vld [vmem:[#allocation5 + $0x50] sm:$0xff]  ;;  %v384_v31 = vld [vmem:[#allocation5 + $0x18] sm:$0xff]  ;;  %s1058_s24 = scalar_lea.vmem %s1057_s13, 32  ;;  %p1059_p10 = scmp.lt.s32.totalorder %s1441_s29, %s1057_s13 }
  0x5d   : > { %891 = vmatpush3.bf16.msra.mxu0 %v888_v6  ;;  %925 = vmatpush3.bf16.msra.mxu1 %v888_v6  ;;  %v392_v32 = vld [vmem:[#allocation5 + $0x58] sm:$0xff]  ;;  %v385_v33 = vld [vmem:[#allocation5 + $0x20] sm:$0xff]  ;;  %v386_v35 = vld [vmem:[#allocation5 + $0x28] sm:$0xff]  ;;  %p1055_p8 = pneg %p1054_p6  ;;  %p1060_p13 = scmp.lt.s32.totalorder %s1058_s24, %s1052_s12 }
  0x5e   : > { %893 = vmatprep.subr.bf16.mxu0 %v892_v9  ;;  %918 = vmatprep.subr.bf16.mxu1 %v892_v9  ;;  %v393_v34 = vld [vmem:[#allocation5 + $0x60] sm:$0xff]  ;;  %v394_v36 = vld [vmem:[#allocation5 + $0x68] sm:$0xff]  ;;  %v387_v37 = vld [vmem:[#allocation5 + $0x30] sm:$0xff] }
  0x5f   : > { %281 = vadd.xlane.f32.xlu0 %v261_v7  ;;  %283 = vadd.xlane.f32.xlu1 %v262_v8  ;;  %v395_v38 = vld [vmem:[#allocation5 + $0x70] sm:$0xff]  ;;  %v388_v39 = vld [vmem:[#allocation5 + $0x38] sm:$0xff]  ;;  %v559_v41 = vld [vmem:[%s1487_s4 + $0x8] sm:$0xff]  ;;  %p1061_p3 = por %p1060_p13, %p1059_p10 }
  0x60   : > { %v396_v40 = vld [vmem:[#allocation5 + $0x78] sm:$0xff]  ;;  %v558_v42 = vld [vmem:[%s1487_s4] sm:$0xff]  ;;  %v560_v43 = vld [vmem:[%s1487_s4 + $0x10] sm:$0xff] }
  0x61   : > { %895 = vmatpush3.bf16.msra.mxu0 %v892_v9  ;;  %926 = vmatpush3.bf16.msra.mxu1 %v892_v9  ;;  %v567_v44 = vld [vmem:[%s1487_s4 + $0x48] sm:$0xff]  ;;  %v561_v45 = vld [vmem:[%s1487_s4 + $0x18] sm:$0xff]  ;;  %v562_v47 = vld [vmem:[%s1487_s4 + $0x20] sm:$0xff]  ;;  %p1062_p7 = pnand %p1061_p3, %p1055_p8 }
  0x62   : > { %897 = vmatprep.subr.bf16.mxu0 %v896_v14  ;;  %919 = vmatprep.subr.bf16.mxu1 %v896_v14  ;;  %v569_v46 = vld [vmem:[%s1487_s4 + $0x58] sm:$0xff]  ;;  %v571_v48 = vld [vmem:[%s1487_s4 + $0x68] sm:$0xff]  ;;  %v564_v51 = vld [vmem:[%s1487_s4 + $0x30] sm:$0xff] }
  0x63   : > { %285 = vadd.xlane.f32.xlu0 %v263_v12  ;;  %287 = vadd.xlane.f32.xlu1 %v264_v13  ;;  %v563_v49 = vld [vmem:[%s1487_s4 + $0x28] sm:$0xff]  ;;  %v573_v50 = vld [vmem:[%s1487_s4 + $0x78] sm:$0xff]  ;;  %v566_v53 = vld [vmem:[%s1487_s4 + $0x40] sm:$0xff] }
  0x64   : > { %v565_v52 = vld [vmem:[%s1487_s4 + $0x38] sm:$0xff]  ;;  %v568_v54 = vld [vmem:[%s1487_s4 + $0x50] sm:$0xff]  ;;  %v570_v55 = vld [vmem:[%s1487_s4 + $0x60] sm:$0xff] }
  0x65   : > { %899 = vmatpush3.bf16.msra.mxu0 %v896_v14  ;;  %927 = vmatpush3.bf16.msra.mxu1 %v896_v14  ;;  %v572_v56 = vld [vmem:[%s1487_s4 + $0x70] sm:$0xff]  ;;  %v321_v60 = vld [vmem:[%s1484_s1] sm:$0xff]  ;;  %v322_v61 = vld [vmem:[%s1484_s1 + $0x8] sm:$0xff] }
  0x66   : > { %901 = vmatprep.subr.bf16.mxu0 %v900_v17  ;;  %920 = vmatprep.subr.bf16.mxu1 %v900_v17  ;;  %v323_v2 = vld [vmem:[%s1484_s1 + $0x10] sm:$0xff]  ;;  %v324_v3 = vld [vmem:[%s1484_s1 + $0x18] sm:$0xff]  ;;  %v325_v7 = vld [vmem:[%s1484_s1 + $0x20] sm:$0xff] }
  0x67   : > { %289 = vadd.xlane.f32.xlu0 %v265_v15  ;;  %291 = vadd.xlane.f32.xlu1 %v266_v16  ;;  %v326_v14 = vld [vmem:[%s1484_s1 + $0x28] sm:$0xff] }
  0x69   : > { %903 = vmatpush3.bf16.msra.mxu0 %v900_v17  ;;  %928 = vmatpush3.bf16.msra.mxu1 %v900_v17 }
  0x6a   : > { %905 = vmatprep.subr.bf16.mxu0 %v904_v20  ;;  %921 = vmatprep.subr.bf16.mxu1 %v904_v20 }
  0x6b   : > { %293 = vadd.xlane.f32.xlu0 %v267_v18  ;;  %295 = vadd.xlane.f32.xlu1 %v268_v19  ;;  %v327_v18 = vld [vmem:[%s1484_s1 + $0x30] sm:$0xff] }
  0x6d   : > { %907 = vmatpush3.bf16.msra.mxu0 %v904_v20  ;;  %929 = vmatpush3.bf16.msra.mxu1 %v904_v20 }
  0x6e   : > { %909 = vmatprep.subr.bf16.mxu0 %v908_v23  ;;  %922 = vmatprep.subr.bf16.mxu1 %v908_v23 }
  0x6f   : > { %297 = vadd.xlane.f32.xlu0 %v269_v21  ;;  %299 = vadd.xlane.f32.xlu1 %v270_v22 }
  0x71   : > { %911 = vmatpush3.bf16.msra.mxu0 %v908_v23  ;;  %930 = vmatpush3.bf16.msra.mxu1 %v908_v23 }
  0x72   : > { %913 = vmatprep.subr.bf16.mxu0 %v912_v26  ;;  %923 = vmatprep.subr.bf16.mxu1 %v912_v26 }
  0x73   : > { %301 = vadd.xlane.f32.xlu0 %v271_v24  ;;  %303 = vadd.xlane.f32.xlu1 %v272_v25  ;;  %v328_v24 = vld [vmem:[%s1484_s1 + $0x38] sm:$0xff] }
  0x75   : > { %915 = vmatpush3.bf16.msra.mxu0 %v912_v26  ;;  %931 = vmatpush3.bf16.msra.mxu1 %v912_v26 }
  0x78   : > { %861 = vmatmul.mubr.f32.vlgmr.msra.gmra.mrb[0].mxu0 %v382_v27  ;;  %873 = vmatmul.mubr.f32.vlgmr.msra.gmra.mrb[0].mxu1 %v390_v28  ;;  %v329_v28 = vld [vmem:[%s1484_s1 + $0x40] sm:$0xff] }
  0x79   : > { %863 = vmatprep.mubr.f32.mxu0 %v383_v29  ;;  %875 = vmatprep.mubr.f32.mxu1 %v391_v30 }
  0x7c   : > { %864 = vmatmul.mubr.f32.gmra.mrb[2].mxu0 %v384_v31  ;;  %876 = vmatmul.mubr.f32.gmra.mrb[2].mxu1 %v392_v32 }
  0x7d   : > { %866 = vmatprep.mubr.f32.mxu0 %v385_v33  ;;  %878 = vmatprep.mubr.f32.mxu1 %v393_v34  ;;  %v330_v34 = vld [vmem:[%s1484_s1 + $0x48] sm:$0xff] }
  0x80   : > { %867 = vmatmul.mubr.f32.gmra.mrb[4].mxu0 %v386_v35  ;;  %879 = vmatmul.mubr.f32.gmra.mrb[4].mxu1 %v394_v36 }
  0x81   : > { %869 = vmatprep.mubr.f32.mxu0 %v387_v37  ;;  %881 = vmatprep.mubr.f32.mxu1 %v395_v38  ;;  %v331_v38 = vld [vmem:[%s1484_s1 + $0x50] sm:$0xff] }
  0x84   : > { %870 = vmatmul.mubr.f32.gmra.mrb[6].mxu0 %v388_v39  ;;  %882 = vmatmul.mubr.f32.gmra.mrb[6].mxu1 %v396_v40 }
  0x85   : > { %581 = vperm.xlu1 %993, %v559_v41  }
  0x89   : > { %576 = vperm.xlu0 %992, %v558_v42   ;;  %586 = vperm.xlu1 %993, %v560_v43  }
  0x8d   : > { %621 = vperm.xlu0 %992, %v567_v44   ;;  %591 = vperm.xlu1 %993, %v561_v45   ;;  %v332_v44 = vld [vmem:[%s1484_s1 + $0x58] sm:$0xff] }
  0x91   : > { %631 = vperm.xlu0 %992, %v569_v46   ;;  %596 = vperm.xlu1 %993, %v562_v47  }
  0x95   : > { %641 = vperm.xlu0 %992, %v571_v48   ;;  %601 = vperm.xlu1 %993, %v563_v49   ;;  %v333_v48 = vld [vmem:[%s1484_s1 + $0x60] sm:$0xff] }
  0x99   : > { %651 = vperm.xlu0 %992, %v573_v50   ;;  %606 = vperm.xlu1 %993, %v564_v51  }
  0x9d   : > { %611 = vperm.xlu1 %993, %v565_v52  }
  0xa1   : > { %616 = vperm.xlu1 %993, %v566_v53  }
  0xa5   : > { %626 = vperm.xlu1 %993, %v568_v54   ;;  %v334_v54 = vld [vmem:[%s1484_s1 + $0x68] sm:$0xff] }
  0xa9   : > { %636 = vperm.xlu1 %993, %v570_v55  }
  0xad   : > { %646 = vperm.xlu1 %993, %v572_v56  }
  0xe4   : > { %v274_v57 = vpop.xlane.xlu0 %273  ;;  %v278_v58 = vpop.xlane.xlu1 %277 }
  0xe5   : > { %v305_v59 = vmul.f32 0.125, %v274_v57  ;;  %v307_v63 = vmul.f32 0.125, %v278_v58  ;;  %v335_v58 = vld [vmem:[%s1484_s1 + $0x70] sm:$0xff] }
  0xe7   : > { %v337_v5 = vmul.f32 %v321_v60, %v305_v59  ;;  %v339_v9 = vmul.f32 %v323_v2, %v307_v63 }
  0xe8   : > { %v276_v62 = vpop.xlane.xlu0 %275  ;;  %v280_v1 = vpop.xlane.xlu1 %279 }
  0xe9   : > { %v306_v0 = vmul.f32 0.125, %v276_v62  ;;  %v308_v4 = vmul.f32 0.125, %v280_v1 }
  0xeb   : > { %v338_v6 = vmul.f32 %v322_v61, %v306_v0  ;;  %v340_v11 = vmul.f32 %v324_v3, %v308_v4  ;;  %v336_v0 = vld [vmem:[%s1484_s1 + $0x78] sm:$0xff] }
  0xec   : > { %v282_v8 = vpop.xlane.xlu0 %281  ;;  %v284_v13 = vpop.xlane.xlu1 %283 }
  0xed   : > { %v353_v10 = vadd.f32 %v338_v6, %v337_v5  ;;  %v309_v12 = vmul.f32 0.125, %v282_v8  ;;  %v310_v15 = vmul.f32 0.125, %v284_v13 }
  0xef   : > { %v354_v16 = vadd.f32 %v353_v10, %v339_v9  ;;  %v341_v17 = vmul.f32 %v325_v7, %v309_v12  ;;  %v342_v21 = vmul.f32 %v326_v14, %v310_v15  ;;  %v375_v14 = vld [vmem:[%s1486_s3] sm:$0x1] }
  0xf0   : > { %v286_v19 = vpop.xlane.xlu0 %285  ;;  %v288_v23 = vpop.xlane.xlu1 %287 }
  0xf1   : > { %v355_v20 = vadd.f32 %v354_v16, %v340_v11  ;;  %v311_v22 = vmul.f32 0.125, %v286_v19  ;;  %v312_v25 = vmul.f32 0.125, %v288_v23 }
  0xf3   : > { %v356_v26 = vadd.f32 %v355_v20, %v341_v17  ;;  %v343_v27 = vmul.f32 %v327_v18, %v311_v22  ;;  %v344_v31 = vmul.f32 %v328_v24, %v312_v25 }
  0xf4   : > { %v290_v29 = vpop.xlane.xlu0 %289  ;;  %v292_v33 = vpop.xlane.xlu1 %291 }
  0xf5   : > { %v357_v30 = vadd.f32 %v356_v26, %v342_v21  ;;  %v313_v32 = vmul.f32 0.125, %v290_v29  ;;  %v314_v35 = vmul.f32 0.125, %v292_v33 }
  0xf7   : > { %v358_v36 = vadd.f32 %v357_v30, %v343_v27  ;;  %v345_v37 = vmul.f32 %v329_v28, %v313_v32  ;;  %v346_v41 = vmul.f32 %v330_v34, %v314_v35 }
  0xf8   : > { %v294_v39 = vpop.xlane.xlu0 %293  ;;  %v296_v43 = vpop.xlane.xlu1 %295 }
  0xf9   : > { %v359_v40 = vadd.f32 %v358_v36, %v344_v31  ;;  %v315_v42 = vmul.f32 0.125, %v294_v39  ;;  %v316_v45 = vmul.f32 0.125, %v296_v43 }
  0xfb   : > { %v360_v46 = vadd.f32 %v359_v40, %v345_v37  ;;  %v347_v47 = vmul.f32 %v331_v38, %v315_v42  ;;  %v348_v51 = vmul.f32 %v332_v44, %v316_v45 }
  0xfc   : > { %v298_v49 = vpop.xlane.xlu0 %297  ;;  %v300_v53 = vpop.xlane.xlu1 %299 }
  0xfd   : > { %v361_v50 = vadd.f32 %v360_v46, %v346_v41  ;;  %v317_v52 = vmul.f32 0.125, %v298_v49  ;;  %v318_v55 = vmul.f32 0.125, %v300_v53 }
  0xff   : > { %v362_v56 = vadd.f32 %v361_v50, %v347_v47  ;;  %v349_v57 = vmul.f32 %v333_v48, %v317_v52  ;;  %v350_v61 = vmul.f32 %v334_v54, %v318_v55 }
 0x100   : > { %v302_v59 = vpop.xlane.xlu0 %301  ;;  %v304_v63 = vpop.xlane.xlu1 %303 }
 0x101   : > { %v363_v60 = vadd.f32 %v362_v56, %v348_v51  ;;  %v319_v62 = vmul.f32 0.125, %v302_v59  ;;  %v320_v1 = vmul.f32 0.125, %v304_v63 }
 0x103   : > { %v364_v2 = vadd.f32 %v363_v60, %v349_v57  ;;  %v351_v3 = vmul.f32 %v335_v58, %v319_v62  ;;  %v352_v5 = vmul.f32 %v336_v0, %v320_v1 }
 0x104   : > { %v582_v18 = vpop.permute.xlu1 %581 }
 0x105   : > { %v365_v4 = vadd.f32 %v364_v2, %v350_v61 }
 0x107   : > { %v366_v6 = vadd.f32 %v365_v4, %v351_v3 }
 0x108   : > { %v587_v19 = vpop.permute.xlu1 %586  ;;  %v577_v24 = vpop.permute.xlu0 %576 }
 0x109   : > { %v367_v7 = vadd.f32 %v366_v6, %v352_v5 }
 0x10b   : > { %v368_v8 = vrot.slane %v367_v7, 4 }
 0x10c   : > { %v592_v20 = vpop.permute.xlu1 %591  ;;  %v622_v51 = vpop.permute.xlu0 %621 }
 0x10d   : > { %v369_v9 = vadd.f32 %v368_v8, %v367_v7 }
 0x10f   : > { %v370_v10 = vrot.slane %v369_v9, 2 }
 0x110   : > { %v597_v21 = vpop.permute.xlu1 %596  ;;  %v632_v2 = vpop.permute.xlu0 %631 }
 0x111   : > { %v371_v11 = vadd.f32 %v370_v10, %v369_v9 }
 0x113   : > { %v372_v12 = vrot.slane %v371_v11, 1 }
 0x114   : > { %v602_v22 = vpop.permute.xlu1 %601 }
 0x115   : > { %v373_v13 = vadd.f32 %v372_v12, %v371_v11 }
 0x117   : > { %v374_v15 = vmax.f32 %v373_v13, 0.0  ;;  %v642_v13 = vpop.permute.xlu0 %641 }
 0x118   : > { %v607_v23 = vpop.permute.xlu1 %606 }
 0x119   : > { %v376_v16 = vmul.f32 %v375_v14, %v374_v15 }
 0x11b   : > { %v378_v17 = vsel %vm377_vm0, %v376_v16, 0.0 }
 0x11c   : > { %379 = vadd.xlane.f32.xlu1 %v378_v17  ;;  %v612_v31 = vpop.permute.xlu1 %611 }
 0x120   : > { %v617_v50 = vpop.permute.xlu1 %616 }
 0x124   : > { %v627_v5 = vpop.permute.xlu1 %626 }
 0x14b   : > { %v862_v25 = vpop.f32.mrb[0].mxu0  ;;  %v874_v26 = vpop.f32.mrb[0].mxu1 }
 0x14c   : > { %v543_v27 = vmax.f32 %v862_v25, 0.0  ;;  %v463_v28 = vpop.f32.mrb[1].mxu0  ;;  %v503_v29 = vpop.f32.mrb[1].mxu1  ;;  %v551_v62 = vmax.f32 %v874_v26, 0.0 }
 0x14d   : > { %v542_v30 = vmax.f32 %v463_v28, 0.0  ;;  %v550_v63 = vmax.f32 %v503_v29, 0.0  ;;  %v652_v25 = vpop.permute.xlu0 %651 }
 0x14e   : > { %v655_v32 = vmul.f32 %v582_v18, %v543_v27  ;;  %v663_v6 = vmul.f32 %v622_v51, %v551_v62  ;;  %v637_v18 = vpop.permute.xlu1 %636 }
 0x14f   : > { %v654_v33 = vmul.f32 %v577_v24, %v542_v30  ;;  %v865_v34 = vpop.f32.mrb[2].mxu0  ;;  %v877_v35 = vpop.f32.mrb[2].mxu1  ;;  %v662_v7 = vmul.f32 %v617_v50, %v550_v63 }
 0x150   : > { %v473_v36 = vpop.f32.mrb[3].mxu0  ;;  %v513_v37 = vpop.f32.mrb[3].mxu1  ;;  %v545_v39 = vmax.f32 %v865_v34, 0.0  ;;  %v553_v8 = vmax.f32 %v877_v35, 0.0 }
 0x151   : > { %v670_v38 = vadd.f32 %v655_v32, %v654_v33  ;;  %v544_v40 = vmax.f32 %v473_v36, 0.0  ;;  %v552_v9 = vmax.f32 %v513_v37, 0.0 }
 0x152   : > { %v657_v46 = vmul.f32 %v592_v20, %v545_v39  ;;  %v665_v17 = vmul.f32 %v632_v2, %v553_v8  ;;  %v647_v27 = vpop.permute.xlu1 %646 }
 0x153   : > { %v656_v41 = vmul.f32 %v587_v19, %v544_v40  ;;  %v868_v42 = vpop.f32.mrb[4].mxu0  ;;  %v880_v43 = vpop.f32.mrb[4].mxu1  ;;  %v664_v14 = vmul.f32 %v627_v5, %v552_v9 }
 0x154   : > { %v483_v44 = vpop.f32.mrb[5].mxu0  ;;  %v523_v45 = vpop.f32.mrb[5].mxu1  ;;  %v547_v48 = vmax.f32 %v868_v42, 0.0  ;;  %v555_v12 = vmax.f32 %v880_v43, 0.0 }
 0x155   : > { %v671_v47 = vadd.f32 %v670_v38, %v656_v41  ;;  %v546_v49 = vmax.f32 %v483_v44, 0.0  ;;  %v554_v15 = vmax.f32 %v523_v45, 0.0 }
 0x156   : > { %v659_v58 = vmul.f32 %v602_v22, %v547_v48  ;;  %v667_v20 = vmul.f32 %v642_v13, %v555_v12 }
 0x157   : > { %v658_v52 = vmul.f32 %v597_v21, %v546_v49  ;;  %v672_v53 = vadd.f32 %v671_v47, %v657_v46  ;;  %v871_v54 = vpop.f32.mrb[6].mxu0  ;;  %v883_v55 = vpop.f32.mrb[6].mxu1  ;;  %v666_v21 = vmul.f32 %v637_v18, %v554_v15 }
 0x158   : > { %v493_v56 = vpop.f32.mrb[7].mxu0  ;;  %v533_v57 = vpop.f32.mrb[7].mxu1  ;;  %v549_v60 = vmax.f32 %v871_v54, 0.0  ;;  %v557_v22 = vmax.f32 %v883_v55, 0.0 }
 0x159   : > { %v673_v59 = vadd.f32 %v672_v53, %v658_v52  ;;  %v548_v61 = vmax.f32 %v493_v56, 0.0 }
 0x15a   : > { %v661_v3 = vmul.f32 %v612_v31, %v549_v60  ;;  %v669_v30 = vmul.f32 %v652_v25, %v557_v22 }
 0x15b   : > { %v660_v0 = vmul.f32 %v607_v23, %v548_v61  ;;  %v674_v1 = vadd.f32 %v673_v59, %v659_v58  ;;  %v556_v23 = vmax.f32 %v533_v57, 0.0 }
 0x15d   : > { %v675_v4 = vadd.f32 %v674_v1, %v660_v0  ;;  %v668_v28 = vmul.f32 %v647_v27, %v556_v23 }
 0x15f   : > { %v676_v10 = vadd.f32 %v675_v4, %v661_v3 }
 0x161   : > { %v677_v11 = vadd.f32 %v676_v10, %v662_v7 }
 0x163   : > { %v678_v16 = vadd.f32 %v677_v11, %v663_v6 }
 0x165   : > { %v679_v19 = vadd.f32 %v678_v16, %v664_v14 }
 0x167   : > { %v680_v24 = vadd.f32 %v679_v19, %v665_v17 }
 0x169   : > { %v681_v26 = vadd.f32 %v680_v24, %v666_v21 }
 0x16b   : > { %v682_v29 = vadd.f32 %v681_v26, %v667_v20 }
 0x16d   : > { %v683_v31 = vadd.f32 %v682_v29, %v668_v28 }
 0x16f   : > { %v684_v32 = vadd.f32 %v683_v31, %v669_v30 }
 0x171   : > { %v685_v33 = vrot.slane %v684_v32, 4 }
 0x173   : > { %v686_v34 = vadd.f32 %v685_v33, %v684_v32 }
 0x175   : > { %v687_v35 = vrot.slane %v686_v34, 2 }
 0x177   : > { %v688_v36 = vadd.f32 %v687_v35, %v686_v34 }
 0x179   : > { %v689_v37 = vrot.slane %v688_v36, 1 }
 0x17b   : > { %v690_v38 = vadd.f32 %v689_v37, %v688_v36 }
 0x1a9   : > { %v380_v39 = vpop.xlane.xlu1 %379 }
 0x1aa   : > { %v691_v40 = vadd.f32 %v690_v38, %v380_v39 }
 0x1ac   : > { %692 = vst [vmem:[%s256_s15] sm:$0x1] %v691_v40 }
 0x1ad   : > { %1065 = shalt.err (!%p1062_p7)
}
 0x1ae   : > { %s1066_s23 = scalar_lea.hbm %s1439_s10, 16  ;;  %s1070_s17 = scalar_lea.hbm %s1488_s5, 32 }
 0x1af   : > { %p1067_p9 = scmp.ne.s32.totalorder %s1439_s10, %s1066_s23  ;;  %p1071_p5 = scmp.lt.u32.totalorder %s1439_s10, %s1488_s5 }
 0x1b0   : > { %p1072_p11 = scmp.lt.u32.totalorder %s1070_s17, %s1066_s23  ;;  %p1074_p4 = scmp.lt.u32.totalorder %s1066_s23, %s1439_s10 }
 0x1b1   : > { %p1068_p1 = pnand %p1067_p9, %p1254_p12 }
 0x1b2   : > { %p1073_p2 = por %p1072_p11, %p1071_p5 }
 0x1b3   : > { %p1069_p0 = pneg %p1068_p1 }
 0x1b4   : > { %p1075_p6 = por %p1074_p4, %p1073_p2 }
 0x1b6   : > { %p1076_p8 = pnand %p1075_p6, %p1069_p0 }
 0x1b8   : > { %1079 = shalt.err (!%p1076_p8)
}
 0x1b9   : > { %938 = dma.vmem_to_hbm [thread:$0]  (%p1254_p12), %s1441_s29, 16, %s1439_s10, %s694_s11  }
 0x1ba PF: > { %s718_s7 = sand.u32 1, %s1110_s18   ;;  %p1503_p10 = scmp.ne.s32.totalorder %s1493_s25, 0 }
 0x1bb   : > { %p1504_p13 = scmp.ge.s32.totalorder %s1122_s21, 2  ;;  %s719_s15 = scalar_lea.sflag [#allocation4], %s718_s7 }
 0x1bd   : > { %p949_p3 = pnand %p1504_p13, %p1503_p10 }
 0x1bf   : > { %1105 = dma.done.wait (!%p949_p3), %s719_s15, 16  }
 0x1c0   : > { %1107 = vsyncadd (!%p949_p3), %s719_s15, 4294967280  ;;  %p19_p7 = scmp.ge.s32.totalorder %s1216_s30, 4   ;;  %s1505_s18 = smov %s1114_s19 }
 0x1c1   : > { %s1506_s19 = smov %s1118_s20  ;;  %s1507_s20 = smov %s1250_s8 }
 0x1c2   : > { %s1508_s21 = smov %s1216_s30  ;;  %21 = sbr.rel (!%p19_p7) target bundleno = 6 (0x6), region = 89 }
 0x1c9   :  { %723 = vsyncpa [#allocation3], 1 }
 0x1ca   :  { %725 = vsyncpa [#allocation3 + $0x1], 1 }
 0x1cb   :  { %726 = vsyncpa [#allocation6], 1 }
 0x1cc   :  { %727 = vsyncpa [#allocation4], 1 }
 0x1cd   :  { %729 = vsyncpa [#allocation4 + $0x1], 1 }

</bundles_post_ra>
